<compile_context>
chip_gen: v5e
topology: v5e:2x2
jax: 0.10.0
libtpu: 0.0.40
codegen_flags: <defaults>
</compile_context>

<pallas_src>
import functools

import jax
import jax.numpy as jnp
from jax.experimental import pallas as pl
from jax.experimental.pallas import tpu as pltpu


def _supcon_kernel(q_ref, k_ref, labq_ref, labk_ref, o_ref, *,
                   temperature: float, row_block: int):
    i = pl.program_id(0)

    q = q_ref[...].astype(jnp.float32)            # (TM, D) query rows
    k = k_ref[...].astype(jnp.float32)            # (B,  D) full key set (resident)

    # F.normalize(dim=1) with eps=1e-12:  x * rsqrt(max(sum(x^2), eps^2)).
    # rsqrt runs on the EUP; fold 1/temperature into the small (TM, D) query
    # operand so no (TM, B) VPU scale is needed after the matmul.
    inv_t = jnp.float32(1.0 / temperature)
    q_n = q * (jax.lax.rsqrt(
        jnp.maximum(jnp.sum(q * q, axis=1, keepdims=True), 1e-24)) * inv_t)
    k_n = k * jax.lax.rsqrt(
        jnp.maximum(jnp.sum(k * k, axis=1, keepdims=True), 1e-24))

    # sim = (q @ k.T) / T without materializing k.T: contract dim 1 of both.
    sim = jax.lax.dot_general(
        q_n, k_n, (((1,), (1,)), ((), ())),
        preferred_element_type=jnp.float32)       # (TM, B)

    tm, b = sim.shape
    lab_q = labq_ref[...]                         # (TM, 1) int32
    lab_k = labk_ref[...]                         # (1,  B) int32 (lane-dense)
    same_class = lab_q == lab_k                   # (TM, B) bool, broadcast compare

    # Self-contrast (diagonal) exclusion, built once as bool and reused.
    row = jax.lax.broadcasted_iota(jnp.int32, (tm, b), 0) + i * row_block
    col = jax.lax.broadcasted_iota(jnp.int32, (tm, b), 1)
    diag = row == col
    pos_mask = jnp.logical_and(
        same_class, jnp.logical_not(diag)).astype(jnp.float32)

    # Stable masked log-sum-exp over non-diagonal columns; mathematically
    # identical to log(sum(exp(sim) * logits_mask)).
    sim_masked = jnp.where(diag, jnp.float32(-1e30), sim)
    row_max = jnp.max(sim_masked, axis=1, keepdims=True)
    denom = jnp.sum(jnp.exp(sim_masked - row_max), axis=1, keepdims=True)
    lse = jnp.log(denom) + row_max

    log_prob = sim - lse                          # (TM, B)
    pos_cnt = jnp.sum(pos_mask, axis=1, keepdims=True)
    # Guard only changes rows with zero positives (0/0 -> NaN in the reference).
    mean_log_prob_pos = (jnp.sum(pos_mask * log_prob, axis=1, keepdims=True)
                         / jnp.maximum(pos_cnt, 1.0))
    o_ref[...] = mean_log_prob_pos                # (TM, 1)


def _pick_row_block(batch: int) -> int:
    # Biggest sublane-aligned row block that divides the batch; (TM, B)
    # intermediates stay small relative to VMEM even at large B.
    for tm in (128, 64, 32, 16, 8):
        if batch % tm == 0:
            return tm
    return batch  # tiny/odd batches: a full-array block is always legal


def supcon_loss(features: jax.Array, labels: jax.Array,
                temperature: float = 0.07) -> jax.Array:
    """features: (B, D) float, labels: (B,) int -> scalar float32 loss."""
    B, D = features.shape
    labels_col = labels.reshape(B, 1).astype(jnp.int32)
    labels_row = labels.reshape(1, B).astype(jnp.int32)

    tm = _pick_row_block(B)
    grid = (B // tm,)

    per_row = pl.pallas_call(
        functools.partial(_supcon_kernel,
                          temperature=float(temperature), row_block=tm),
        out_shape=jax.ShapeDtypeStruct((B, 1), jnp.float32),
        grid_spec=pltpu.PrefetchScalarGridSpec(
            num_scalar_prefetch=0,
            grid=grid,
            in_specs=[
                pl.BlockSpec((tm, D), lambda i: (i, 0)),   # query row block
                pl.BlockSpec((B, D), lambda i: (0, 0)),    # full keys, resident
                pl.BlockSpec((tm, 1), lambda i: (i, 0)),   # query labels (column)
                pl.BlockSpec((1, B), lambda i: (0, 0)),    # key labels (lane-dense)
            ],
            out_specs=pl.BlockSpec((tm, 1), lambda i: (i, 0)),
        ),
        compiler_params=pltpu.CompilerParams(
            dimension_semantics=("parallel",),             # megacore-friendly
            vmem_limit_bytes=48 * 1024 * 1024,             # headroom vs v7x 64 MiB
        ),
    )(features, features, labels_col, labels_row)

    # Final scalar reduction (B floats) stays in the wrapper so the grid
    # axis remains fully independent/parallel.
    return -jnp.mean(per_row[:, 0])


def _supcon_loss_ref(features, labels, temperature=0.07):
    """Pure-JAX reference mirroring the PyTorch module."""
    B = features.shape[0]
    f = features / jnp.maximum(
        jnp.linalg.norm(features, axis=1, keepdims=True), 1e-12)
    sim = (f @ f.T) / temperature
    lab = labels.reshape(-1, 1)
    mask = (lab == lab.T).astype(jnp.float32)
    logits_mask = 1.0 - jnp.eye(B, dtype=jnp.float32)
    mask = mask * logits_mask
    exp_logits = jnp.exp(sim) * logits_mask
    log_prob = sim - jnp.log(exp_logits.sum(1, keepdims=True))
    mean_log_prob_pos = (mask * log_prob).sum(1) / mask.sum(1)
    return -mean_log_prob_pos.mean()


if __name__ == "__main__":
    key = jax.random.PRNGKey(0)

    # Small shape consistent with the module: B=16, D=32, 4 classes.
    B, D = 16, 32
    features = jax.random.normal(key, (B, D), dtype=jnp.float32)
    labels = jnp.arange(B, dtype=jnp.int32) % 4

    loss = supcon_loss(features, labels, temperature=0.07)
    loss = jax.block_until_ready(loss)
    ref = _supcon_loss_ref(features, labels, temperature=0.07)
    assert jnp.allclose(loss, ref, rtol=1e-5, atol=1e-4), (loss, ref)

    # Second check exercising the multi-block (tiled) path: B=256 -> 2 blocks.
    B2, D2 = 256, 64
    k1, k2 = jax.random.split(key)
    features2 = jax.random.normal(k1, (B2, D2), dtype=jnp.float32)
    labels2 = jnp.arange(B2, dtype=jnp.int32) % 8

    loss2 = supcon_loss(features2, labels2, temperature=0.07)
    loss2 = jax.block_until_ready(loss2)
    ref2 = _supcon_loss_ref(features2, labels2, temperature=0.07)
    assert jnp.allclose(loss2, ref2, rtol=1e-5, atol=1e-4), (loss2, ref2)

    print("KERNEL_OK")
</pallas_src>

<mosaic_0001>
module attributes {stable_mosaic.version = 11 : i64} {
  func.func @_supcon_kernel(%arg0: i32, %arg1: memref<16x32xf32, #tpu.memory_space<vmem>>, %arg2: memref<16x32xf32, #tpu.memory_space<vmem>>, %arg3: memref<16x1xi32, #tpu.memory_space<vmem>>, %arg4: memref<1x16xi32, #tpu.memory_space<vmem>>, %arg5: memref<16x1xf32, #tpu.memory_space<vmem>>) attributes {dimension_semantics = [#tpu.dimension_semantics<parallel>], iteration_bounds = array<i64: 1>, scalar_prefetch = 0 : i64, scratch_operands = 0 : i64, tpu.core_type = #tpu.core_type<tc>, window_params = [{transform_indices = @transform_0, window_bounds = array<i64: 16, 32>}, {pipeline_mode = #tpu.pipeline_mode<synchronous>, transform_indices = @transform_1, window_bounds = array<i64: 16, 32>}, {transform_indices = @transform_2, window_bounds = array<i64: 16, 1>}, {pipeline_mode = #tpu.pipeline_mode<synchronous>, transform_indices = @transform_3, window_bounds = array<i64: 1, 16>}, {transform_indices = @transform_4, window_bounds = array<i64: 16, 1>}]} {
    %c0 = arith.constant 0 : index
    %c0_0 = arith.constant 0 : index
    %0 = vector.load %arg1[%c0, %c0_0] : memref<16x32xf32, #tpu.memory_space<vmem>>, vector<16x32xf32>
    %c0_1 = arith.constant 0 : index
    %c0_2 = arith.constant 0 : index
    %1 = vector.load %arg2[%c0_1, %c0_2] : memref<16x32xf32, #tpu.memory_space<vmem>>, vector<16x32xf32>
    %2 = arith.mulf %0, %0 : vector<16x32xf32>
    %cst = arith.constant dense<0.000000e+00> : vector<16xf32>
    %3 = vector.multi_reduction <add>, %2, %cst [1] : vector<16x32xf32> to vector<16xf32>
    %4 = vector.shape_cast %3 : vector<16xf32> to vector<16x1xf32>
    %cst_3 = arith.constant 1.000000e-24 : f32
    %5 = vector.broadcast %cst_3 : f32 to vector<16x1xf32>
    %6 = arith.maximumf %4, %5 : vector<16x1xf32>
    %7 = math.rsqrt %6 : vector<16x1xf32>
    %cst_4 = arith.constant 14.2857141 : f32
    %8 = vector.broadcast %cst_4 : f32 to vector<16x1xf32>
    %9 = arith.mulf %7, %8 : vector<16x1xf32>
    %10 = vector.broadcast %9 : vector<16x1xf32> to vector<16x32xf32>
    %11 = arith.mulf %0, %10 : vector<16x32xf32>
    %12 = arith.mulf %1, %1 : vector<16x32xf32>
    %cst_5 = arith.constant dense<0.000000e+00> : vector<16xf32>
    %13 = vector.multi_reduction <add>, %12, %cst_5 [1] : vector<16x32xf32> to vector<16xf32>
    %14 = vector.shape_cast %13 : vector<16xf32> to vector<16x1xf32>
    %cst_6 = arith.constant 1.000000e-24 : f32
    %15 = vector.broadcast %cst_6 : f32 to vector<16x1xf32>
    %16 = arith.maximumf %14, %15 : vector<16x1xf32>
    %17 = math.rsqrt %16 : vector<16x1xf32>
    %18 = vector.broadcast %17 : vector<16x1xf32> to vector<16x32xf32>
    %19 = arith.mulf %1, %18 : vector<16x32xf32>
    %cst_7 = arith.constant dense<0.000000e+00> : vector<16x16xf32>
    %20 = tpu.matmul %11, %19, %cst_7 {dimension_numbers = #tpu.dot_dimension_numbers<[1], [1], [0], [0], [0, 0, 1, 0], [], []>} : vector<16x32xf32>, vector<16x32xf32>, vector<16x16xf32> -> vector<16x16xf32>
    %c0_8 = arith.constant 0 : index
    %c0_9 = arith.constant 0 : index
    %21 = vector.load %arg3[%c0_8, %c0_9] : memref<16x1xi32, #tpu.memory_space<vmem>>, vector<16x1xi32>
    %c0_10 = arith.constant 0 : index
    %c0_11 = arith.constant 0 : index
    %22 = vector.load %arg4[%c0_10, %c0_11] : memref<1x16xi32, #tpu.memory_space<vmem>>, vector<1x16xi32>
    %23 = vector.broadcast %21 : vector<16x1xi32> to vector<16x16xi32>
    %24 = vector.broadcast %22 : vector<1x16xi32> to vector<16x16xi32>
    %25 = arith.cmpi eq, %23, %24 : vector<16x16xi32>
    %26 = tpu.iota {dimensions = array<i32: 0>} : vector<16x16xi32>
    %c16_i32 = arith.constant 16 : i32
    %27 = arith.muli %arg0, %c16_i32 : i32
    %28 = vector.broadcast %27 : i32 to vector<16x16xi32>
    %29 = arith.addi %26, %28 : vector<16x16xi32>
    %30 = tpu.iota {dimensions = array<i32: 1>} : vector<16x16xi32>
    %31 = arith.cmpi eq, %29, %30 : vector<16x16xi32>
    %cst_12 = arith.constant dense<true> : vector<16x16xi1>
    %32 = arith.xori %31, %cst_12 : vector<16x16xi1>
    %33 = arith.andi %25, %32 : vector<16x16xi1>
    %34 = arith.extui %33 : vector<16x16xi1> to vector<16x16xi32>
    %35 = arith.sitofp %34 : vector<16x16xi32> to vector<16x16xf32>
    %cst_13 = arith.constant -1.000000e+30 : f32
    %36 = vector.broadcast %cst_13 : f32 to vector<16x16xf32>
    %37 = arith.select %31, %36, %20 : vector<16x16xi1>, vector<16x16xf32>
    %cst_14 = arith.constant dense<0xFF800000> : vector<16xf32>
    %38 = vector.multi_reduction <maximumf>, %37, %cst_14 [1] : vector<16x16xf32> to vector<16xf32>
    %39 = vector.shape_cast %38 : vector<16xf32> to vector<16x1xf32>
    %40 = vector.broadcast %39 : vector<16x1xf32> to vector<16x16xf32>
    %41 = arith.subf %37, %40 : vector<16x16xf32>
    %42 = math.exp %41 : vector<16x16xf32>
    %cst_15 = arith.constant dense<0.000000e+00> : vector<16xf32>
    %43 = vector.multi_reduction <add>, %42, %cst_15 [1] : vector<16x16xf32> to vector<16xf32>
    %44 = vector.shape_cast %43 : vector<16xf32> to vector<16x1xf32>
    %45 = math.log %44 : vector<16x1xf32>
    %46 = arith.addf %45, %39 : vector<16x1xf32>
    %47 = vector.broadcast %46 : vector<16x1xf32> to vector<16x16xf32>
    %48 = arith.subf %20, %47 : vector<16x16xf32>
    %cst_16 = arith.constant dense<0.000000e+00> : vector<16xf32>
    %49 = vector.multi_reduction <add>, %35, %cst_16 [1] : vector<16x16xf32> to vector<16xf32>
    %50 = vector.shape_cast %49 : vector<16xf32> to vector<16x1xf32>
    %51 = arith.mulf %35, %48 : vector<16x16xf32>
    %cst_17 = arith.constant dense<0.000000e+00> : vector<16xf32>
    %52 = vector.multi_reduction <add>, %51, %cst_17 [1] : vector<16x16xf32> to vector<16xf32>
    %53 = vector.shape_cast %52 : vector<16xf32> to vector<16x1xf32>
    %cst_18 = arith.constant 1.000000e+00 : f32
    %54 = vector.broadcast %cst_18 : f32 to vector<16x1xf32>
    %55 = arith.maximumf %50, %54 : vector<16x1xf32>
    %56 = arith.divf %53, %55 : vector<16x1xf32>
    %c0_19 = arith.constant 0 : index
    %c0_20 = arith.constant 0 : index
    %57 = vector.load %arg5[%c0_19, %c0_20] : memref<16x1xf32, #tpu.memory_space<vmem>>, vector<16x1xf32>
    tpu.vector_store %arg5[%c0_19, %c0_20], %56 {strides = array<i32>} : memref<16x1xf32, #tpu.memory_space<vmem>>, vector<16x1xf32>,
    return
  }
  func.func @transform_0(%arg0: i32) -> (i32, i32) {
    %c0_i32 = arith.constant 0 : i32
    %c0_i32_0 = arith.constant 0 : i32
    return %arg0, %c0_i32 : i32, i32
  }
  func.func @transform_1(%arg0: i32) -> (i32, i32) {
    %c0_i32 = arith.constant 0 : i32
    %c0_i32_0 = arith.constant 0 : i32
    %c0_i32_1 = arith.constant 0 : i32
    return %c0_i32, %c0_i32_0 : i32, i32
  }
  func.func @transform_2(%arg0: i32) -> (i32, i32) {
    %c0_i32 = arith.constant 0 : i32
    %c0_i32_0 = arith.constant 0 : i32
    return %arg0, %c0_i32 : i32, i32
  }
  func.func @transform_3(%arg0: i32) -> (i32, i32) {
    %c0_i32 = arith.constant 0 : i32
    %c0_i32_0 = arith.constant 0 : i32
    %c0_i32_1 = arith.constant 0 : i32
    return %c0_i32, %c0_i32_0 : i32, i32
  }
  func.func @transform_4(%arg0: i32) -> (i32, i32) {
    %c0_i32 = arith.constant 0 : i32
    %c0_i32_0 = arith.constant 0 : i32
    return %arg0, %c0_i32 : i32, i32
  }
}

</mosaic_0001>

<bundles_post_ra>
// kernel: tpu_custom_call.1
= control target key start
LH: loop header
LB: loop body
LE: loop exit
PB: predicated region body
PF: predicated region fallthrough
CT: control target
= control target key end

     0   :  { %9 = vsyncpa [#allocation3], 0  ;;  %s316_s18 = smov [#allocation2]   ;;  %s317_s20 = smov 128   ;;  %s408_s0 = inlined_call_operand.vmem [shape: f32[16,32], index: 0, kind: input, shape index: {}]   ;;  %s409_s1 = inlined_call_operand.hbm [shape: f32[16,32], index: 1, kind: input, shape index: {}]   ;;  %s410_s2 = inlined_call_operand.vmem [shape: s32[16,1], index: 2, kind: input, shape index: {}]   ;;  %s411_s3 = inlined_call_operand.vmem [shape: s32[1,16], index: 3, kind: input, shape index: {}]   ;;  %s412_s4 = inlined_call_operand.vmem [shape: f32[16,1], index: 4, kind: output, shape index: {}]  }
   0x1   :  { %s16_s17 = sshll.u32 %s409_s1, 4  ;;  %s18_s19 = sshll.u32 %s316_s18, 4  ;;  %s17_s17 = int_to_ptr.hbm [resolvable:$true] %s16_s17  ;;  %s19_s19 = int_to_ptr.vmem [resolvable:$true] %s18_s19 }
   0x2   :  { %s318_s21 = smov 8  }
   0x3   :  { %24 = dma.hbm_to_vmem [thread:$0]  %s17_s17, 256, %s19_s19, [#allocation3], %s317_s20, %s317_s20, %s318_s21  }
   0x4   :  { %314 = dma.done.wait [#allocation3], 256  }
   0x5   :  { %315 = vsyncadd [#allocation3], 4294967040  ;;  %v36_v0 = vld [vmem:[#allocation2 + $0x8] sm:$0xff]  ;;  %vm39_vm0 = vcmask 261120   ;;  %v353_v1 = vld [vmem:[%s408_s0] sm:$0xff]  ;;  %v319_v55 = vmov 0   ;;  %v151_v56 = vlaneseq }
   0x6   :  { %v73_v2 = vmul.f32 %v36_v0, %v36_v0  ;;  %v37_v3 = vmul.f32 %v353_v1, %v353_v1  ;;  %v357_v4 = vld [vmem:[#allocation2] sm:$0xff]  ;;  %v362_v5 = vld [vmem:[%s408_s0 + $0x8] sm:$0xff]  ;;  %267 = vset.pattern.permute.xlu0 %v319_v55  ;;  %268 = vset.pattern.permute.xlu1 %v319_v55  ;;  %vm172_vm14 = vcmask 130048  }
   0x7   :  { %v72_v8 = vmul.f32 %v357_v4, %v357_v4  ;;  %v38_v9 = vmul.f32 %v362_v5, %v362_v5  ;;  %v139_v54 = vld [vmem:[%s410_s2] sm:$0xff]  ;;  %v159_v57 = vand.u32 127, %v151_v56  ;;  %v152_v58 = vshrl.u32 %v151_v56, 7 }
   0x8   :  { %v77_v6 = vsel %vm39_vm0, %v73_v2, 0.0  ;;  %v40_v7 = vsel %vm39_vm0, %v37_v3, 0.0  ;;  %v140_v2 = vld [vmem:[%s410_s2 + $0x8] sm:$0xff] }
   0x9   :  { %78 = vadd.xlane.f32.xlu0 %v77_v6  ;;  %41 = vadd.xlane.f32.xlu1 %v40_v7  ;;  %v74_v10 = vsel %vm39_vm0, %v72_v8, 0.0  ;;  %v43_v11 = vsel %vm39_vm0, %v38_v9, 0.0  ;;  %vm160_vm13 = vcmp.eq.s32.totalorder %v152_v58, %v159_v57  ;;  %v153_v60 = vadd.s32 8, %v152_v58 }
   0xb   :  { %vm161_vm15 = vcmp.eq.s32.totalorder %v153_v60, %v159_v57 }
  0x11   :  { %75 = vadd.xlane.f32.xlu0 %v74_v10  ;;  %44 = vadd.xlane.f32.xlu1 %v43_v11  ;;  %v269_v11 = vld [vmem:[%s411_s3] ss:$0 sm:$0xff] }
  0x25   :  { %143 = vperm.xlu0 %267, %v139_v54  }
  0x2a   :  { %146 = vperm.xlu1 %268, %v140_v2  }
  0x7c   :  { %v79_v12 = vpop.xlane.xlu0 %78  ;;  %v42_v13 = vpop.xlane.xlu1 %41 }
  0x7d   :  { %v81_v14 = vmax.f32 %v79_v12, 1e-24  ;;  %v46_v15 = vmax.f32 %v42_v13, 1e-24 }
  0x7f   :  { %270 = vrsqrt.f32 %v81_v14  ;;  %vm98_vm2 = vweird.f32 %v81_v14  ;;  %vm54_vm4 = vweird.f32 %v46_v15 }
  0x80   :  { %272 = vrsqrt.f32 %v46_v15 }
  0x84   :  { %v76_v16 = vpop.xlane.xlu0 %75  ;;  %v45_v17 = vpop.xlane.xlu1 %44 }
  0x85   :  { %v271_v18 = vpop.eup %270  ;;  %v80_v19 = vmax.f32 %v76_v16, 1e-24  ;;  %v47_v20 = vmax.f32 %v45_v17, 1e-24 }
  0x86   :  { %v273_v21 = vpop.eup %272  ;;  %v93_v22 = vmul.f32 %v271_v18, %v81_v14  ;;  %vm99_vm1 = vweird.f32 %v271_v18 }
  0x87   :  { %v49_v23 = vmul.f32 %v273_v21, %v46_v15  ;;  %274 = vrsqrt.f32 %v80_v19  ;;  %vm100_vm3 = vmor %vm98_vm2, %vm99_vm1  ;;  %vm55_vm5 = vweird.f32 %v273_v21  ;;  %vm64_vm8 = vweird.f32 %v47_v20 }
  0x88   :  { %v94_v24 = vmul.f32 %v271_v18, %v93_v22  ;;  %276 = vrsqrt.f32 %v47_v20  ;;  %vm56_vm6 = vmor %vm54_vm4, %vm55_vm5  ;;  %vm88_vm10 = vweird.f32 %v80_v19  ;;  %v321_v15 = vmov 0.0  }
  0x89   :  { %v50_v25 = vmul.f32 %v273_v21, %v49_v23 }
  0x8a   :  { %v95_v26 = vmul.f32 0.5, %v94_v24 }
  0x8b   :  { %v51_v27 = vmul.f32 0.5, %v50_v25 }
  0x8c   :  { %v96_v28 = vsub.f32 1.5, %v95_v26 }
  0x8d   :  { %v275_v29 = vpop.eup %274  ;;  %v52_v30 = vsub.f32 1.5, %v51_v27 }
  0x8e   :  { %v277_v31 = vpop.eup %276  ;;  %v83_v32 = vmul.f32 %v275_v29, %v80_v19  ;;  %v97_v33 = vmul.f32 %v271_v18, %v96_v28  ;;  %vm89_vm7 = vweird.f32 %v275_v29 }
  0x8f   :  { %v59_v34 = vmul.f32 %v277_v31, %v47_v20  ;;  %v53_v37 = vmul.f32 %v273_v21, %v52_v30  ;;  %vm65_vm9 = vweird.f32 %v277_v31  ;;  %vm90_vm11 = vmor %vm88_vm10, %vm89_vm7 }
  0x90   :  { %v84_v35 = vmul.f32 %v275_v29, %v83_v32  ;;  %v101_v36 = vsel %vm100_vm3, %v271_v18, %v97_v33  ;;  %vm66_vm12 = vmor %vm64_vm8, %vm65_vm9 }
  0x91   :  { %v60_v38 = vmul.f32 %v277_v31, %v59_v34  ;;  %v103_v39 = vmul.f32 %v101_v36, %v36_v0  ;;  %v57_v44 = vsel %vm56_vm6, %v273_v21, %v53_v37 }
  0x92   :  { %v85_v40 = vmul.f32 0.5, %v84_v35  ;;  %v68_v48 = vmul.f32 14.285714, %v57_v44 }
  0x93   :  { %v61_v41 = vmul.f32 0.5, %v60_v38  ;;  %253 = vmatpush.xpose.msk.msra.mxu0 %vm39_vm0, %v103_v39  ;;  %259 = vmatpush.xpose.msk.msra.mxu1 %vm39_vm0, %v103_v39 }
  0x94   :  { %v86_v42 = vsub.f32 1.5, %v85_v40  ;;  %v70_v52 = vmul.f32 %v68_v48, %v353_v1 }
  0x95   :  { %v62_v43 = vsub.f32 1.5, %v61_v41 }
  0x96   :  { %v87_v45 = vmul.f32 %v275_v29, %v86_v42 }
  0x97   :  { %v63_v46 = vmul.f32 %v277_v31, %v62_v43  ;;  %v144_v12 = vpop.permute.xlu0 %143 }
  0x98   :  { %v91_v47 = vsel %vm90_vm11, %v275_v29, %v87_v45  ;;  %vm149_vm2 = vcmp.eq.s32.totalorder %v144_v12, %v269_v11 }
  0x99   :  { %v102_v49 = vmul.f32 %v91_v47, %v357_v4  ;;  %v67_v50 = vsel %vm66_vm12, %v277_v31, %v63_v46 }
  0x9a   :  { %v69_v51 = vmul.f32 14.285714, %v67_v50 }
  0x9b   :  { %254 = vmatpush.xpose.msk.msra.mxu0 %vm39_vm0, %v102_v49  ;;  %260 = vmatpush.xpose.msk.msra.mxu1 %vm39_vm0, %v102_v49 }
  0x9c   :  { %v71_v53 = vmul.f32 %v69_v51, %v362_v5  ;;  %v147_v18 = vpop.permute.xlu1 %146 }
  0x9d   :  { %vm150_vm5 = vcmp.eq.s32.totalorder %v147_v18, %v269_v11 }
  0x9e   :  { %255 = vmatmul.msk.f32.vlgmr.msra.gmra.mxu0 %vm39_vm0, %v70_v52  ;;  %256 = vmatmul.msk.f32.vlgmr.msra.gmra.mxu1 %vm39_vm0, %v71_v53  ;;  %vm320_vm0 = vmmov 1  }
  0x9f   :  { %vm162_vm1 = vmxor %vm160_vm13, %vm320_vm0 }
  0xa0   :  { %vm164_vm3 = vmand %vm149_vm2, %vm162_vm1 }
  0xa1   :  { %v257_v16 = vsel %vm164_vm3, 1.0, %v321_v15  ;;  %vm163_vm4 = vmxor %vm161_vm15, %vm320_vm0 }
  0xa2   :  { %v199_v17 = vsel %vm172_vm14, %v257_v16, 0.0  ;;  %vm165_vm6 = vmand %vm150_vm5, %vm163_vm4 }
  0xa3   :  { %v258_v19 = vsel %vm165_vm6, 1.0, %v321_v15 }
  0xa4   :  { %v202_v20 = vsel %vm172_vm14, %v258_v19, 0.0 }
 0x11b   :  { %v133_v59 = vpop.f32.mrf.mxu0  ;;  %v136_v63 = vpop.f32.mrf.mxu1 }
 0x11c   :  { %v170_v61 = vsel %vm160_vm13, -1e+30, %v133_v59  ;;  %v171_v0 = vsel %vm161_vm15, -1e+30, %v136_v63  ;;  %vm245_vm13 = vcmask 7168  }
 0x11d   :  { %v173_v62 = vsel %vm172_vm14, %v170_v61, -inf  ;;  %v176_v1 = vsel %vm172_vm14, %v171_v0, -inf }
 0x11e   :  { %174 = vmax.xlane.f32.xlu2 %v173_v62 }
 0x126   :  { %177 = vmax.xlane.f32.xlu2 %v176_v1 }
 0x191   :  { %v175_v3 = vpop.xlane.xlu2 %174 }
 0x192   :  { %v179_v4 = vsub.f32 %v170_v61, %v175_v3 }
 0x194   :  { %v181_v5 = vmul.f32 1.442695, %v179_v4 }
 0x196   :  { %278 = vpow2.f32 %v181_v5 }
 0x199   :  { %v178_v6 = vpop.xlane.xlu2 %177 }
 0x19a   :  { %v180_v7 = vsub.f32 %v171_v0, %v178_v6 }
 0x19c   :  { %v279_v8 = vpop.eup %278  ;;  %v183_v9 = vmul.f32 1.442695, %v180_v7 }
 0x19d   :  { %v185_v10 = vsel %vm172_vm14, %v279_v8, 0.0 }
 0x19e   :  { %280 = vpow2.f32 %v183_v9  ;;  %186 = vadd.xlane.f32.xlu2 %v185_v10 }
 0x1a4   :  { %v281_v13 = vpop.eup %280 }
 0x1a5   :  { %v188_v14 = vsel %vm172_vm14, %v281_v13, 0.0 }
 0x1a6   :  { %189 = vadd.xlane.f32.xlu2 %v188_v14 }
 0x1ae   :  { %200 = vadd.xlane.f32.xlu2 %v199_v17 }
 0x1b6   :  { %203 = vadd.xlane.f32.xlu2 %v202_v20 }
 0x211   :  { %v187_v21 = vpop.xlane.xlu2 %186 }
 0x212   :  { %282 = vlog2.f32 %v187_v21 }
 0x218   :  { %v283_v22 = vpop.eup %282 }
 0x219   :  { %v192_v23 = vmul.f32 0.6931472, %v283_v22  ;;  %v190_v24 = vpop.xlane.xlu2 %189 }
 0x21a   :  { %284 = vlog2.f32 %v190_v24 }
 0x21b   :  { %v195_v25 = vadd.f32 %v192_v23, %v175_v3 }
 0x21d   :  { %v197_v26 = vsub.f32 %v133_v59, %v195_v25 }
 0x21f   :  { %v205_v27 = vmul.f32 %v257_v16, %v197_v26 }
 0x220   :  { %v285_v28 = vpop.eup %284 }
 0x221   :  { %v194_v29 = vmul.f32 0.6931472, %v285_v28  ;;  %v207_v30 = vsel %vm172_vm14, %v205_v27, 0.0  ;;  %v201_v35 = vpop.xlane.xlu2 %200 }
 0x222   :  { %208 = vadd.xlane.f32.xlu1 %v207_v30  ;;  %v213_v36 = vmax.f32 %v201_v35, 1.0 }
 0x223   :  { %v196_v31 = vadd.f32 %v194_v29, %v178_v6 }
 0x224   :  { %286 = vrcp.f32 %v213_v36  ;;  %vm220_vm7 = vweird.f32 %v213_v36  ;;  %v226_v45 = vand.u32 2147483648, %v213_v36  ;;  %v224_v47 = vand.u32 2147483647, %v213_v36 }
 0x225   :  { %v198_v32 = vsub.f32 %v136_v63, %v196_v31 }
 0x226   :  { %v227_v49 = vor.u32 1.1754944e-38, %v226_v45  ;;  %vm225_vm10 = vcmp.eq.f32.partialorder %v224_v47, 8.507059e+37 }
 0x227   :  { %v206_v33 = vmul.f32 %v258_v19, %v198_v32 }
 0x229   :  { %v210_v34 = vsel %vm172_vm14, %v206_v33, 0.0  ;;  %v204_v37 = vpop.xlane.xlu2 %203 }
 0x22a   :  { %211 = vadd.xlane.f32.xlu2 %v210_v34  ;;  %v214_v38 = vmax.f32 %v204_v37, 1.0  ;;  %v287_v39 = vpop.eup %286 }
 0x22b   :  { %v216_v40 = vmul.f32 %v287_v39, %v213_v36  ;;  %vm221_vm8 = vweird.f32 %v287_v39 }
 0x22c   :  { %288 = vrcp.f32 %v214_v38  ;;  %vm222_vm9 = vmor %vm220_vm7, %vm221_vm8  ;;  %vm235_vm11 = vweird.f32 %v214_v38  ;;  %v241_v54 = vand.u32 2147483648, %v214_v38  ;;  %v239_v57 = vand.u32 2147483647, %v214_v38 }
 0x22d   :  { %v217_v41 = vsub.f32 1.0, %v216_v40 }
 0x22e   :  { %v242_v58 = vor.u32 1.1754944e-38, %v241_v54  ;;  %vm240_vm15 = vcmp.eq.f32.partialorder %v239_v57, 8.507059e+37 }
 0x22f   :  { %v218_v43 = vmul.f32 %v287_v39, %v217_v41 }
 0x231   :  { %v219_v46 = vadd.f32 %v287_v39, %v218_v43 }
 0x232   :  { %v289_v42 = vpop.eup %288 }
 0x233   :  { %v231_v44 = vmul.f32 %v289_v42, %v214_v38  ;;  %v223_v50 = vsel %vm222_vm9, %v287_v39, %v219_v46  ;;  %vm236_vm12 = vweird.f32 %v289_v42 }
 0x234   :  { %v228_v52 = vsel %vm225_vm10, %v227_v49, %v223_v50  ;;  %vm237_vm14 = vmor %vm235_vm11, %vm236_vm12 }
 0x235   :  { %v232_v48 = vsub.f32 1.0, %v231_v44 }
 0x237   :  { %v233_v51 = vmul.f32 %v289_v42, %v232_v48 }
 0x239   :  { %v234_v56 = vadd.f32 %v289_v42, %v233_v51 }
 0x23b   :  { %v238_v59 = vsel %vm237_vm14, %v289_v42, %v234_v56 }
 0x23c   :  { %v243_v60 = vsel %vm240_vm15, %v242_v58, %v238_v59 }
 0x295   :  { %v209_v53 = vpop.xlane.xlu1 %208 }
 0x296   :  { %v229_v55 = vmul.f32 %v228_v52, %v209_v53 }
 0x298   :  { %246 = vst.msk [vmem:[%s412_s4] sm:$0xff] %vm245_vm13, %v229_v55 }
 0x29d   :  { %v212_v61 = vpop.xlane.xlu2 %211 }
 0x29e   :  { %v244_v62 = vmul.f32 %v243_v60, %v212_v61 }
 0x2a0   :  { %247 = vst.msk [vmem:[%s412_s4 + $0x8] sm:$0xff] %vm245_vm13, %v244_v62 }
 0x2a1   :  { %252 = vsyncpa [#allocation3], 1 }

</bundles_post_ra>
